<compile_context>
chip_gen: v7x
topology: tpu7x:2x2x1
jax: 0.10.0
libtpu: 0.0.40
codegen_flags: <defaults>
</compile_context>

<pallas_src>
import jax
import jax.numpy as jnp
from jax import lax
from jax.experimental import pallas as pl
from jax.experimental.pallas import tpu as pltpu


def _pos_embed_reference(mask, col_embed_weight, row_embed_weight):
    """Pure-JAX reference mirroring the PyTorch forward (also the fallback)."""
    B, H, W = mask.shape
    x_emb = col_embed_weight[:W]                          # (W, F)
    y_emb = row_embed_weight[:H]                          # (H, F)
    x_rep = jnp.broadcast_to(x_emb[None, :, :], (H, W, x_emb.shape[1]))
    y_rep = jnp.broadcast_to(y_emb[:, None, :], (H, W, y_emb.shape[1]))
    pos = jnp.concatenate([x_rep, y_rep], axis=-1)        # (H, W, 2F)
    pos = jnp.transpose(pos, (2, 0, 1))[None]             # (1, 2F, H, W)
    return jnp.broadcast_to(pos, (B,) + pos.shape[1:])


def _make_kernel(height, width, hw_pad, tc, use_mxu):
    hw = height * width

    def kernel(x_t_ref, y_t_ref, out_ref):
        # x_t_ref: (F, W) col embeddings, channel-major (VMEM-resident, DMA'd once)
        # y_t_ref: (F, H) row embeddings, channel-major
        # out_ref: (2, tc, hw_pad) — out_ref[0]/out_ref[1] are the x / y halves of
        #          this channel tile, lane-dense over the flattened H*W axis.
        i = pl.program_id(0)
        c0 = pl.multiple_of(i * tc, tc)              # sublane-aligned channel offset
        x_t = x_t_ref[pl.ds(c0, tc), :]              # (tc, W)
        y_t = y_t_ref[pl.ds(c0, tc), :]              # (tc, H)

        if use_mxu:
            # One-hot selection matmuls — MXU output is lane-dense, so no XLU
            # lane relayout of the slab is ever materialized.
            #   x_part[c, h*W + w] = x_t[c, w]  ->  x_t @ T_x, T_x[w', k] = [k % W == w']
            #   y_part[c, h*W + w] = y_t[c, h]  ->  y_t @ T_y, T_y[h', k] = [k // W == h']
            # Pad lanes (k >= H*W) are written as 0 and sliced off in the wrapper.
            k_x = lax.broadcasted_iota(jnp.int32, (width, hw_pad), 1).astype(jnp.float32)
            w_row = lax.broadcasted_iota(jnp.int32, (width, hw_pad), 0).astype(jnp.float32)
            # Exact floor-div by a constant via f32 (avoids vector integer div).
            h_of_k = jnp.floor((k_x + 0.5) * (1.0 / width))
            w_of_k = k_x - h_of_k * width
            t_x = ((w_of_k == w_row) & (k_x < hw)).astype(jnp.float32)      # (W, hw_pad)

            k_y = lax.broadcasted_iota(jnp.int32, (height, hw_pad), 1)
            row_start = lax.broadcasted_iota(jnp.int32, (height, hw_pad), 0) * width
            t_y = ((k_y >= row_start) & (k_y < row_start + width)).astype(jnp.float32)

            # f32 inputs at HIGHEST precision: one-hot selection is exact — no
            # bf16 rounding of the embedding weights.
            x_part = jnp.dot(x_t, t_x, preferred_element_type=jnp.float32,
                             precision=lax.Precision.HIGHEST)               # (tc, hw_pad)
            y_part = jnp.dot(y_t, t_y, preferred_element_type=jnp.float32,
                             precision=lax.Precision.HIGHEST)               # (tc, hw_pad)
        else:
            # W is already a multiple of 128: the (tc, H, W) -> (tc, H*W) collapse
            # is a layout no-op, so the plain broadcast is free (hw_pad == hw).
            x_part = jnp.broadcast_to(x_t[:, None, :], (tc, height, width)).reshape(tc, hw)
            y_part = jnp.broadcast_to(y_t[:, :, None], (tc, height, width)).reshape(tc, hw)

        # Two direct full-width stores (no concatenate): tc % 8 == 0 and
        # hw_pad % 128 == 0, so both are unmasked, aligned stores.
        out_ref[0, :, :] = x_part.astype(out_ref.dtype)
        out_ref[1, :, :] = y_part.astype(out_ref.dtype)

    return kernel


def _pick_channel_tile(num_feats, hw_pad, itemsize, budget_bytes=8 << 20):
    """Largest Tc (multiple of 8, dividing F) whose double-buffered output tile
    (2 halves x 2 buffers x Tc x hw_pad) fits the per-step VMEM budget —
    conservative enough for v7x (64 MiB VMEM) and v5e (16 MiB default scoped)."""
    max_tc = max(8, budget_bytes // (4 * hw_pad * itemsize))
    tc = min(num_feats, int(max_tc))
    tc -= tc % 8
    tc = max(tc, 8)
    while num_feats % tc:
        tc -= 8
    return tc


def position_embedding_learned(mask, col_embed_weight, row_embed_weight, *,
                               out_dtype=jnp.float32, channel_tile=None,
                               min_slab_bytes=256 * 1024, force_pallas=False):
    """Equivalent of PositionEmbeddingLearned.forward.

    Args:
      mask: (B, H, W) — only its shape is used.
      col_embed_weight: (col_num_embed, num_feats) float32.
      row_embed_weight: (row_num_embed, num_feats) float32.
      out_dtype: output dtype (bf16 halves HBM write traffic; f32 matches torch).
      channel_tile: override for the channel grid tile Tc (must be %8 and divide F).
      min_slab_bytes / force_pallas: below the threshold the broadcast is left to
        XLA (the pallas_call fixed overhead dominates tiny slabs).

    Returns:
      pos: (B, 2*num_feats, H, W) of `out_dtype`.
    """
    B, H, W = mask.shape
    num_feats = col_embed_weight.shape[1]
    itemsize = jnp.dtype(out_dtype).itemsize
    slab_bytes = 2 * num_feats * H * W * itemsize

    # Fallback: tiny slabs (pure call overhead) or odd F (aligned-store layout
    # assumes F % 8 == 0) -> plain jnp, fused into the consumer by XLA.
    use_pallas = (num_feats % 8 == 0) and (force_pallas or slab_bytes >= min_slab_bytes)
    if not use_pallas:
        return _pos_embed_reference(mask, col_embed_weight, row_embed_weight).astype(out_dtype)

    hw = H * W
    hw_pad = ((hw + 127) // 128) * 128          # full-width lanes for every vst
    use_mxu = (W % 128 != 0)                    # reshape is free only if W is a lane multiple

    if channel_tile is None:
        tc = _pick_channel_tile(num_feats, hw_pad, itemsize)
    else:
        tc = int(channel_tile)
        if tc % 8 != 0 or num_feats % tc != 0:
            raise ValueError("channel_tile must be a multiple of 8 that divides num_feats")

    # Embedding lookup with arange(W)/arange(H) indices is a leading-row slice;
    # the tiny channel-major transposes are hoisted to the wrapper.
    x_t = col_embed_weight[:W].T.astype(jnp.float32)     # (F, W)
    y_t = row_embed_weight[:H].T.astype(jnp.float32)     # (F, H)

    flops = 2 * num_feats * hw_pad * (W + H) if use_mxu else 0
    bytes_accessed = (x_t.size + y_t.size) * 4 + 2 * num_feats * hw_pad * itemsize

    slab = pl.pallas_call(
        _make_kernel(H, W, hw_pad, tc, use_mxu),
        out_shape=jax.ShapeDtypeStruct((2, num_feats, hw_pad), out_dtype),
        grid=(num_feats // tc,),
        in_specs=[
            # Untiled, constant index maps: parameters are DMA'd once and stay
            # VMEM-resident across the whole channel grid.
            pl.BlockSpec((num_feats, W), lambda i: (0, 0)),
            pl.BlockSpec((num_feats, H), lambda i: (0, 0)),
        ],
        out_specs=pl.BlockSpec((2, tc, hw_pad), lambda i: (0, i, 0)),
        compiler_params=pltpu.CompilerParams(dimension_semantics=("parallel",)),
        cost_estimate=pl.CostEstimate(flops=int(flops), transcendentals=0,
                                      bytes_accessed=int(bytes_accessed)),
    )(x_t, y_t)

    if hw_pad != hw:
        slab = slab[:, :, :hw]
    # (2, F, H*W) -> (2F, H, W) is a contiguous (free) reshape; channel order is
    # [col_embed channels, row_embed channels], matching torch.cat(..., dim=-1).
    pos = slab.reshape(2 * num_feats, H, W)
    # Lazy batch broadcast (the slab is identical for every b).
    return jnp.broadcast_to(pos[None], (B, 2 * num_feats, H, W))


if __name__ == "__main__":
    # Small deterministic setup consistent with the module:
    # num_feats=16, row_num_embed=col_num_embed=20, mask (B=2, H=16, W=16).
    num_feats = 16
    row_num_embed = 20
    col_num_embed = 20
    B, H, W = 2, 16, 16

    key = jax.random.PRNGKey(0)
    k_row, k_col, k_mask = jax.random.split(key, 3)
    # nn.init.uniform_ -> U[0, 1)
    row_embed_weight = jax.random.uniform(k_row, (row_num_embed, num_feats), jnp.float32)
    col_embed_weight = jax.random.uniform(k_col, (col_num_embed, num_feats), jnp.float32)
    mask = jax.random.bernoulli(k_mask, 0.5, (B, H, W))

    # force_pallas: the 32 KiB test slab would otherwise take the XLA fallback;
    # channel_tile=8 exercises a 2-step channel grid.
    pos = position_embedding_learned(mask, col_embed_weight, row_embed_weight,
                                     channel_tile=8, force_pallas=True)
    pos = jax.block_until_ready(pos)

    ref = _pos_embed_reference(mask, col_embed_weight, row_embed_weight)
    assert pos.shape == (B, 2 * num_feats, H, W), pos.shape
    assert pos.dtype == jnp.float32, pos.dtype
    # Exact equality: the kernel only selects/copies f32 values (one-hot matmul
    # at HIGHEST precision), so any difference is a precision regression.
    assert jnp.array_equal(pos, ref), "mismatch vs reference"

    print("KERNEL_OK")
</pallas_src>

<mosaic_0001>
module attributes {stable_mosaic.version = 11 : i64} {
  func.func @kernel(%arg0: i32, %arg1: memref<16x16xf32, #tpu.memory_space<vmem>>, %arg2: memref<16x16xf32, #tpu.memory_space<vmem>>, %arg3: memref<2x8x256xf32, #tpu.memory_space<vmem>>) attributes {dimension_semantics = [#tpu.dimension_semantics<parallel>], iteration_bounds = array<i64: 2>, scalar_prefetch = 0 : i64, scratch_operands = 0 : i64, tpu.core_type = #tpu.core_type<tc>, window_params = [{pipeline_mode = #tpu.pipeline_mode<synchronous>, transform_indices = @transform_0, window_bounds = array<i64: 16, 16>}, {pipeline_mode = #tpu.pipeline_mode<synchronous>, transform_indices = @transform_1, window_bounds = array<i64: 16, 16>}, {transform_indices = @transform_2, window_bounds = array<i64: 2, 8, 256>}]} {
    %c8_i32 = arith.constant 8 : i32
    %0 = arith.muli %arg0, %c8_i32 : i32
    %1 = tpu.assume_multiple %0, 8 : i32
    %2 = arith.index_cast %1 : i32 to index
    %c0 = arith.constant 0 : index
    %3 = vector.load %arg1[%2, %c0] : memref<16x16xf32, #tpu.memory_space<vmem>>, vector<8x16xf32>
    %4 = arith.index_cast %1 : i32 to index
    %c0_0 = arith.constant 0 : index
    %5 = vector.load %arg2[%4, %c0_0] : memref<16x16xf32, #tpu.memory_space<vmem>>, vector<8x16xf32>
    %6 = tpu.iota {dimensions = array<i32: 1>} : vector<16x256xi32>
    %7 = arith.sitofp %6 : vector<16x256xi32> to vector<16x256xf32>
    %8 = tpu.iota {dimensions = array<i32: 0>} : vector<16x256xi32>
    %9 = arith.sitofp %8 : vector<16x256xi32> to vector<16x256xf32>
    %cst = arith.constant 5.000000e-01 : f32
    %10 = vector.broadcast %cst : f32 to vector<16x256xf32>
    %11 = arith.addf %7, %10 : vector<16x256xf32>
    %cst_1 = arith.constant 6.250000e-02 : f32
    %12 = vector.broadcast %cst_1 : f32 to vector<16x256xf32>
    %13 = arith.mulf %11, %12 : vector<16x256xf32>
    %14 = math.floor %13 : vector<16x256xf32>
    %cst_2 = arith.constant 1.600000e+01 : f32
    %15 = vector.broadcast %cst_2 : f32 to vector<16x256xf32>
    %16 = arith.mulf %14, %15 : vector<16x256xf32>
    %17 = arith.subf %7, %16 : vector<16x256xf32>
    %18 = arith.cmpf oeq, %17, %9 : vector<16x256xf32>
    %cst_3 = arith.constant 2.560000e+02 : f32
    %19 = vector.broadcast %cst_3 : f32 to vector<16x256xf32>
    %20 = arith.cmpf olt, %7, %19 : vector<16x256xf32>
    %21 = arith.andi %18, %20 : vector<16x256xi1>
    %22 = arith.extui %21 : vector<16x256xi1> to vector<16x256xi32>
    %23 = arith.sitofp %22 : vector<16x256xi32> to vector<16x256xf32>
    %24 = tpu.iota {dimensions = array<i32: 1>} : vector<16x256xi32>
    %25 = tpu.iota {dimensions = array<i32: 0>} : vector<16x256xi32>
    %c16_i32 = arith.constant 16 : i32
    %26 = vector.broadcast %c16_i32 : i32 to vector<16x256xi32>
    %27 = arith.muli %25, %26 : vector<16x256xi32>
    %28 = arith.cmpi sge, %24, %27 : vector<16x256xi32>
    %c16_i32_4 = arith.constant 16 : i32
    %29 = vector.broadcast %c16_i32_4 : i32 to vector<16x256xi32>
    %30 = arith.addi %27, %29 : vector<16x256xi32>
    %31 = arith.cmpi slt, %24, %30 : vector<16x256xi32>
    %32 = arith.andi %28, %31 : vector<16x256xi1>
    %33 = arith.extui %32 : vector<16x256xi1> to vector<16x256xi32>
    %34 = arith.sitofp %33 : vector<16x256xi32> to vector<16x256xf32>
    %cst_5 = arith.constant dense<0.000000e+00> : vector<8x256xf32>
    %35 = tpu.matmul %3, %23, %cst_5 {dimension_numbers = #tpu.dot_dimension_numbers<[1], [0], [0], [1], [0, 0, 1, 1], [], []>, precision = #tpu.contract_precision<fp32>} : vector<8x16xf32>, vector<16x256xf32>, vector<8x256xf32> -> vector<8x256xf32>
    %cst_6 = arith.constant dense<0.000000e+00> : vector<8x256xf32>
    %36 = tpu.matmul %5, %34, %cst_6 {dimension_numbers = #tpu.dot_dimension_numbers<[1], [0], [0], [1], [0, 0, 1, 1], [], []>, precision = #tpu.contract_precision<fp32>} : vector<8x16xf32>, vector<16x256xf32>, vector<8x256xf32> -> vector<8x256xf32>
    %c0_7 = arith.constant 0 : index
    %c0_8 = arith.constant 0 : index
    %c0_9 = arith.constant 0 : index
    %37 = vector.load %arg3[%c0_7, %c0_8, %c0_9] : memref<2x8x256xf32, #tpu.memory_space<vmem>>, vector<1x8x256xf32>
    %38 = vector.shape_cast %37 : vector<1x8x256xf32> to vector<8x256xf32>
    %39 = vector.shape_cast %35 : vector<8x256xf32> to vector<1x8x256xf32>
    tpu.vector_store %arg3[%c0_7, %c0_8, %c0_9], %39 {strides = array<i32>} : memref<2x8x256xf32, #tpu.memory_space<vmem>>, vector<1x8x256xf32>,
    %c1 = arith.constant 1 : index
    %c0_10 = arith.constant 0 : index
    %c0_11 = arith.constant 0 : index
    %40 = vector.load %arg3[%c1, %c0_10, %c0_11] : memref<2x8x256xf32, #tpu.memory_space<vmem>>, vector<1x8x256xf32>
    %41 = vector.shape_cast %40 : vector<1x8x256xf32> to vector<8x256xf32>
    %42 = vector.shape_cast %36 : vector<8x256xf32> to vector<1x8x256xf32>
    tpu.vector_store %arg3[%c1, %c0_10, %c0_11], %42 {strides = array<i32>} : memref<2x8x256xf32, #tpu.memory_space<vmem>>, vector<1x8x256xf32>,
    return
  }
  func.func @transform_0(%arg0: i32) -> (i32, i32) {
    %c0_i32 = arith.constant 0 : i32
    %c0_i32_0 = arith.constant 0 : i32
    %c0_i32_1 = arith.constant 0 : i32
    return %c0_i32, %c0_i32_0 : i32, i32
  }
  func.func @transform_1(%arg0: i32) -> (i32, i32) {
    %c0_i32 = arith.constant 0 : i32
    %c0_i32_0 = arith.constant 0 : i32
    %c0_i32_1 = arith.constant 0 : i32
    return %c0_i32, %c0_i32_0 : i32, i32
  }
  func.func @transform_2(%arg0: i32) -> (i32, i32, i32) {
    %c0_i32 = arith.constant 0 : i32
    %c0_i32_0 = arith.constant 0 : i32
    %c0_i32_1 = arith.constant 0 : i32
    return %c0_i32, %arg0, %c0_i32_0 : i32, i32, i32
  }
}

</mosaic_0001>

<bundles_post_ra>
// kernel: tpu_custom_call.1
= control target key start
LH: loop header
LB: loop body
LE: loop exit
PB: predicated region body
PF: predicated region fallthrough
CT: control target
= control target key end

     0   :  { %7 = vsyncpa [#allocation3], 0  ;;  %s2018_s0 = inlined_call_operand.hbm [shape: f32[16,16], index: 0, kind: input, shape index: {}]   ;;  %s2019_s1 = inlined_call_operand.hbm [shape: f32[16,16], index: 1, kind: input, shape index: {}]   ;;  %s2020_s2 = inlined_call_operand.hbm [shape: f32[2,16,256], index: 2, kind: output, shape index: {}]  }
   0x1   :  { %8 = vsyncpa [#allocation6], 0 }
   0x2   :  { %9 = vsyncpa [#allocation4], 0 }
   0x3   :  { %11 = vsyncpa [#allocation4 + $0x1], 0  ;;  %s1640_s9 = smov 0   ;;  %s1642_s10 = smov 0  }
   0x4   :  { %s1644_s11 = smov 0   ;;  %s1646_s12 = smov 0  }
   0x5 LB: > { %s1661_s13 = sadd.s32 4294967295, %s1613_s12   ;;  %s1303_s14 = sadd.s32 4294967294, %s1613_s12   ;;  %s1613_s12 = sphi %s1646_s12, %s2054_s12   ;;  %s1609_s11 = sphi %s1644_s11, %s2053_s11   ;;  %s1605_s10 = sphi %s1642_s10, %s2052_s10   ;;  %s1601_s9 = sphi %s1640_s9, %s2051_s9  }
   0x6   : > { %s1665_s15 = sadd.s32 1, %s1613_s12   ;;  %s66_s16 = sadd.s32 1, %s1609_s11 }
   0x7   : > { %s63_s17 = ssub.s32 %s1613_s12, %s1665_s15  ;;  %p76_p0 = scmp.ne.s32.totalorder %s1609_s11, %s1605_s10 }
   0x8   : > { %p64_p1 = scmp.eq.s32.totalorder %s63_s17, 0  ;;  %p77_p2 = scmp.eq.s32.totalorder %s1661_s13, 1 }
   0x9   : > { %p82_p3 = scmp.ne.s32.totalorder %s1605_s10, %s1601_s9  ;;  %p83_p4 = scmp.eq.s32.totalorder %s1303_s14, 1 }
   0xa   : > { %s1676_s18 = scalar_select %p64_p1, %s1609_s11, %s66_s16  }
   0xb   : > { %p1678_p5 = por %p77_p2, %p76_p0  ;;  %p1682_p6 = por %p83_p4, %p82_p3 }
   0xc   : > { %p1304_p7 = scmp.ge.s32.totalorder %s1613_s12, 1  ;;  %p90_p8 = scmp.lt.s32.totalorder %s1613_s12, 3 }
   0xd   : > { %s2024_s19 = scalar_select %p1678_p5, 1, 0 }
   0xe   : > { %s2025_s20 = scalar_select %p1682_p6, 1, 0 }
   0xf   : > { %p2021_p9 = scmp.eq.s32.totalorder %s1661_s13, 0  ;;  %p1689_p10 = pnand %p1304_p7, %p90_p8 }
  0x10   : > { %s1615_s22 = smov [#allocation2]   ;;  %s1616_s25 = smov [#allocation5]  }
  0x11   : > { %s2026_s21 = scalar_select %p1689_p10, 1, 0 }
  0x12   : > { %s102_s23 = sshll.u32 %s1615_s22, 4  ;;  %p1430_p11 = pneg %p1689_p10  ;;  %s103_s23 = int_to_ptr.vmem [resolvable:$true] %s102_s23 }
  0x13   : > { %s115_s26 = sshll.u32 %s1616_s25, 4  ;;  %s1487_s29 = scalar_lea.hbm %s2018_s0, 256  ;;  %s1701_s26 = int_to_ptr.vmem [resolvable:$true] %s115_s26 }
  0x14   : > { %p1697_p12 = pnand %p2021_p9, %p1430_p11  ;;  %p1488_p13 = scmp.ne.s32.totalorder %s2018_s0, %s1487_s29 }
  0x15   : > { %p1494_p3 = scmp.lt.u32.totalorder %s1487_s29, %s2018_s0 }
  0x16   : > { %p1489_p0 = pneg %p1697_p12 }
  0x18   : > { %p1490_p1 = pnand %p1489_p0, %p1488_p13 }
  0x1a   : > { %p1491_p2 = pneg %p1490_p1 }
  0x1c   : > { %p1496_p4 = pnand %p1494_p3, %p1491_p2 }
  0x1e   : > { %1499 = shalt.err (!%p1496_p4)
}
  0x1f   : > { %s1500_s6 = scalar_lea.vmem %s103_s23, 256  ;;  %p1508_p9 = scmp.lt.s32.totalorder %s103_s23, %s103_s23 }
  0x20   : > { %p1501_p7 = scmp.ne.s32.totalorder %s103_s23, %s1500_s6  ;;  %p1509_p6 = scmp.lt.s32.totalorder %s1500_s6, %s1500_s6 }
  0x22   : > { %p1503_p8 = pnand %p1501_p7, %p1489_p0  ;;  %p1510_p5 = por %p1509_p6, %p1508_p9 }
  0x24   : > { %p1504_p11 = pneg %p1503_p8 }
  0x26   : > { %p1511_p10 = pnand %p1510_p5, %p1504_p11 }
  0x28   : > { %1514 = shalt.err (!%p1511_p10)
}
  0x29   : > { %s1617_s7 = smov 128   ;;  %s1618_s8 = smov 8  }
  0x2a   : > { %1433 = dma.hbm_to_vmem [thread:$0]  (!%p1697_p12), %s2018_s0, 256, %s103_s23, [#allocation3], %s1617_s7, %s1617_s7, %s1618_s8  }
  0x2b   : > { %s1515_s25 = scalar_lea.hbm %s2019_s1, 256 }
  0x2c   : > { %p1516_p13 = scmp.ne.s32.totalorder %s2019_s1, %s1515_s25  ;;  %p1522_p9 = scmp.lt.u32.totalorder %s1515_s25, %s2019_s1 }
  0x2e   : > { %p1518_p5 = pnand %p1516_p13, %p1489_p0 }
  0x30   : > { %p1519_p6 = pneg %p1518_p5 }
  0x32   : > { %p1524_p10 = pnand %p1522_p9, %p1519_p6 }
  0x34   : > { %1527 = shalt.err (!%p1524_p10)
}
  0x35   : > { %s1528_s23 = scalar_lea.vmem %s1701_s26, 256  ;;  %p1536_p4 = scmp.lt.s32.totalorder %s1701_s26, %s1701_s26 }
  0x36   : > { %p1529_p1 = scmp.ne.s32.totalorder %s1701_s26, %s1528_s23  ;;  %p1537_p7 = scmp.lt.s32.totalorder %s1528_s23, %s1528_s23 }
  0x38   : > { %p1531_p2 = pnand %p1529_p1, %p1489_p0  ;;  %p1538_p8 = por %p1537_p7, %p1536_p4 }
  0x3a   : > { %p1532_p3 = pneg %p1531_p2 }
  0x3c   : > { %p1539_p11 = pnand %p1538_p8, %p1532_p3 }
  0x3e   : > { %1542 = shalt.err (!%p1539_p11)
}
  0x3f   : > { %1436 = dma.hbm_to_vmem [thread:$0]  (!%p1697_p12), %s2019_s1, 256, %s1701_s26, [#allocation6], %s1617_s7, %s1617_s7, %s1618_s8  }
  0x40   : > { %p2028_p13 = scmp.ne.s32.totalorder %s2026_s21, 0 }
  0x41   : > { %p2029_p5 = scmp.eq.s32.totalorder (!%p2028_p13), %s1661_s13, 0 }
  0x42   : > { %131 = sbr.rel (%p2028_p13) target bundleno = 377 (0x179), region = 28 }
  0x49   : > { %1588 = dma.done.wait (%p2029_p5), [#allocation3], 256   ;;  %p2030_p0 = pmov %p2029_p5 }
  0x4b   : > { %1590 = vsyncadd (%p2030_p0), [#allocation3], 4294967040  ;;  %p2031_p6 = pmov %p2030_p0 }
  0x4c   : > { %p2032_p9 = pmov %p2030_p0 }
  0x4d   : > { %1592 = dma.done.wait (%p2031_p6), [#allocation6], 256  }
  0x4e   : > { %1594 = vsyncadd (%p2032_p9), [#allocation6], 4294967040  ;;  %v157_v0 = vlaneseq  ;;  %v1619_v1 = vmov 0.0   ;;  %s1311_s24 = sshll.u32 %s1661_s13, 3  ;;  %vm219_vm0 = vcmask 130048   ;;  %s149_s5 = sand.u32 1, %s1605_s10  }
  0x4f   : > { %785 = vmatprep.mubr.f32.mxu1 %v1619_v1  ;;  %291 = vmatprep.mubr.f32.mxu0 %v1619_v1  ;;  %s155_s21 = scalar_lea.vmem [#allocation5], %s1311_s24  ;;  %s153_s26 = scalar_lea.vmem [#allocation2], %s1311_s24  ;;  %v1620_v32 = vmov 1.0|1.0  }
  0x50   : > { %v158_v2 = vand.u32 127, %v157_v0  ;;  %v1763_v3 = vshrl.u32 %v157_v0, 7  ;;  %v156_v11 = vld [vmem:[%s155_s21] sm:$0xff]  ;;  %s1310_s6 = sshll.u32 %s149_s5, 5  ;;  %s1351_s14 = sshll.u32 %s1661_s13, 8 }
  0x51   : > { %v715_v17 = vsel %vm219_vm0, %v156_v11, 0  ;;  %v154_v19 = vld [vmem:[%s153_s26] sm:$0xff]  ;;  %s151_s7 = scalar_lea.vmem [#allocation7], %s1310_s6  ;;  %s1975_s22 = scalar_lea.hbm %s2020_s2, %s1351_s14 }
  0x52   : > { %v159_v4 = vadd.s32 128, %v158_v2  ;;  %v1766_v5 = vadd.s32 8, %v1763_v3  ;;  %v195_v6 = vmul.u32 16, %v1763_v3  ;;  %v1769_v7 = vcvt.s32.f32 %v158_v2  ;;  %s1227_s8 = sshll.u32 %s151_s7, 4  ;;  %s1977_s25 = scalar_lea.sflag [#allocation4], %s149_s5  ;;  %s1970_s8 = int_to_ptr.vmem [resolvable:$true] %s1227_s8 }
  0x53   : > { %v165_v10 = vcvt.s32.f32 %v1763_v3  ;;  %v1792_v22 = vand.u32 4294901760, %v715_v17  ;;  %v221_v31 = vsel %vm219_vm0, %v154_v19, 0  ;;  %s1543_s27 = scalar_lea.vmem %s1970_s8, 512  ;;  %p2049_p10 = scmp.ne.s32.totalorder %s2024_s19, 0 }
  0x54   : > { %v196_v8 = vmul.u32 16, %v1766_v5  ;;  %vm198_vm1 = vcmp.ge.s32.totalorder %v159_v4, %v195_v6  ;;  %v201_v9 = vadd.s32 16, %v195_v6  ;;  %vm197_vm2 = vcmp.ge.s32.totalorder %v158_v2, %v195_v6  ;;  %p1544_p12 = scmp.ne.s32.totalorder %s1970_s8, %s1543_s27  ;;  %s1621_s13 = smov [#allocation7]  }
  0x55   : > { %v1773_v12 = vcvt.s32.f32 %v159_v4  ;;  %v166_v13 = vcvt.s32.f32 %v1766_v5  ;;  %v167_v14 = vadd.f32 0.5, %v1769_v7  ;;  %v1810_v30 = vsub.f32 %v715_v17, %v1792_v22  ;;  %s1547_s28 = sshll.u32 %s1621_s13, 4  ;;  %s1548_s28 = int_to_ptr.vmem [resolvable:$false] %s1547_s28 }
  0x56   : > { %vm200_vm3 = vcmp.ge.s32.totalorder %v159_v4, %v196_v8  ;;  %v202_v15 = vadd.s32 16, %v196_v8  ;;  %vm204_vm4 = vcmp.lt.s32.totalorder %v159_v4, %v201_v9  ;;  %vm199_vm5 = vcmp.ge.s32.totalorder %v158_v2, %v196_v8  ;;  %p1545_p1 = pnand %p1544_p12, %p2049_p10  ;;  %s1549_s29 = scalar_lea.vmem %s1548_s28, 1024 }
  0x57   : > { %vm1777_vm6 = vmand %vm198_vm1, %vm204_vm4  ;;  %vm203_vm7 = vcmp.lt.s32.totalorder %v158_v2, %v201_v9  ;;  %v168_v18 = vadd.f32 0.5, %v1773_v12  ;;  %vm182_vm8 = vcmp.lt.f32.partialorder %v1773_v12, 256.0  ;;  %v169_v26 = vmul.f32 0.0625, %v167_v14  ;;  %p1550_p3 = scmp.lt.s32.totalorder %s1970_s8, %s1548_s28  ;;  %p1551_p4 = scmp.lt.s32.totalorder %s1549_s29, %s1543_s27 }
  0x58   : > { %vm206_vm9 = vcmp.lt.s32.totalorder %v159_v4, %v202_v15  ;;  %v1317_v20 = vsel %vm1777_vm6, 1.0, %v1619_v1  ;;  %vm205_vm10 = vcmp.lt.s32.totalorder %v158_v2, %v202_v15  ;;  %vm1788_vm11 = vmand %vm197_vm2, %vm203_vm7  ;;  %v788_v40 = vand.u32 4294901760, %v1810_v30  ;;  %p1546_p2 = pneg %p1545_p1 }
  0x59   : > { %vm210_vm12 = vmand %vm200_vm3, %vm206_vm9  ;;  %v1795_v23 = vsub.f32 %v1317_v20, %v1317_v20  ;;  %v1316_v24 = vsel %vm1788_vm11, 1.0, %v1619_v1  ;;  %v170_v25 = vmul.f32 0.0625, %v168_v18  ;;  %v171_v36 = vfloor.f32 %v169_v26  ;;  %p1552_p7 = por %p1551_p4, %p1550_p3 }
  0x5a   : > { %v1319_v27 = vsel %vm210_vm12, 1.0, %v1619_v1  ;;  %vm1803_vm13 = vmpackc.low %vm210_vm12, %vm1777_vm6  ;;  %v1807_v29 = vsub.f32 %v1316_v24, %v1316_v24  ;;  %v1830_v41 = vand.u32 4294901760, %v221_v31  ;;  %v789_v47 = vsub.f32 %v1810_v30, %v788_v40 }
  0x5b   : > { %1377 = vmatprep.subr.msk.bf16.mxu1 %vm1803_vm13, %v1620_v32  ;;  %v1816_v33 = vsub.f32 %v1319_v27, %v1319_v27  ;;  %vm209_vm14 = vmand %vm199_vm5, %vm205_vm10  ;;  %v172_v34 = vfloor.f32 %v170_v25  ;;  %v799_v35 = vand.u32 4294901760, %v1795_v23  ;;  %v173_v48 = vmul.f32 16.0, %v171_v36  ;;  %p1553_p8 = pnand %p1552_p7, %p1546_p2 }
  0x5c   : > { %v1318_v37 = vsel %vm209_vm14, 1.0, %v1619_v1  ;;  %vm1824_vm15 = vmpackc.low %vm209_vm14, %vm1788_vm11  ;;  %v805_v39 = vand.u32 4294901760, %v1807_v29  ;;  %v1848_v49 = vsub.f32 %v221_v31, %v1830_v41  ;;  %v790_v55 = vand.u32 4294901760, %v789_v47 }
  0x5d   : > { %1379 = vmatpush1.bf16.msk.msra.mxu1 %vm1824_vm15, %v1620_v32  ;;  %v1835_v42 = vsub.f32 %v1318_v37, %v1318_v37  ;;  %v174_v43 = vmul.f32 16.0, %v172_v34  ;;  %v800_v44 = vsub.f32 %v1795_v23, %v799_v35  ;;  %v811_v45 = vand.u32 4294901760, %v1816_v33 }
  0x5e   : > { %v806_v46 = vsub.f32 %v1807_v29, %v805_v39  ;;  %v175_v56 = vsub.f32 %v1769_v7, %v173_v48  ;;  %v294_v57 = vand.u32 4294901760, %v1848_v49  ;;  %vm181_vm5 = vcmp.lt.f32.partialorder %v1769_v7, 256.0 }
  0x5f   : > { %v817_v50 = vand.u32 4294901760, %v1835_v42  ;;  %v176_v51 = vsub.f32 %v1773_v12, %v174_v43  ;;  %v801_v52 = vand.u32 4294901760, %v800_v44  ;;  %v812_v53 = vsub.f32 %v1816_v33, %v811_v45 }
  0x60   : > { %v807_v54 = vand.u32 4294901760, %v806_v46  ;;  %791 = vmatmul.mubr.f32.vlgmr.msra.gmra.mrb[0].mxu1 %v790_v55  ;;  %vm1868_vm3 = vcmp.eq.f32.partialorder %v175_v56, %v165_v10  ;;  %vm1874_vm4 = vcmp.eq.f32.partialorder %v175_v56, %v166_v13  ;;  %v295_v2 = vsub.f32 %v1848_v49, %v294_v57 }
  0x61   : > { %v818_v58 = vsub.f32 %v1835_v42, %v817_v50  ;;  %vm178_vm0 = vcmp.eq.f32.partialorder %v176_v51, %v165_v10  ;;  %vm180_vm1 = vcmp.eq.f32.partialorder %v176_v51, %v166_v13  ;;  %v813_v59 = vand.u32 4294901760, %v812_v53  ;;  %881 = vmatprep.mubr.f32.mxu1 %v1619_v1  ;;  %vm185_vm9 = vmand %vm1874_vm4, %vm181_vm5 }
  0x62   : > { %vm184_vm2 = vmand %vm178_vm0, %vm182_vm8  ;;  %v1384_v6 = vpack.c.bf16 %v1816_v33, %v1795_v23  ;;  %v1386_v12 = vpack.c.bf16 %v1835_v42, %v1807_v29  ;;  %v1314_v13 = vsel %vm185_vm9, 1.0, %v1619_v1  ;;  %v296_v16 = vand.u32 4294901760, %v295_v2 }
  0x63   : > { %v819_v62 = vand.u32 4294901760, %v818_v58  ;;  %vm186_vm6 = vmand %vm180_vm1, %vm182_vm8  ;;  %v1313_v63 = vsel %vm184_vm2, 1.0, %v1619_v1  ;;  %v1380_v0 = vpack.c.bf16 %v813_v59, %v801_v52  ;;  %v322_v7 = vsub.f32 %v1314_v13, %v1314_v13 }
  0x64   : > { %v1315_v3 = vsel %vm186_vm6, 1.0, %v1619_v1  ;;  %vm1887_vm7 = vmpackc.low %vm186_vm6, %vm184_vm2  ;;  %v304_v5 = vsub.f32 %v1313_v63, %v1313_v63  ;;  %v1392_v44 = vpack.c.bf16 %v811_v45, %v799_v35  ;;  %v1394_v23 = vpack.c.bf16 %v817_v50, %v805_v39 }
  0x65   : > { %1353 = vmatprep.subr.msk.bf16.mxu0 %vm1887_vm7, %v1620_v32  ;;  %v316_v8 = vsub.f32 %v1315_v3, %v1315_v3  ;;  %1381 = vmatprep.subr.bf16.mxu1 %v1380_v0  ;;  %vm183_vm8 = vmand %vm1868_vm3, %vm181_vm5  ;;  %v1382_v9 = vpack.c.bf16 %v819_v62, %v807_v54  ;;  %v323_v21 = vand.u32 4294901760, %v322_v7 }
  0x66   : > { %v1312_v10 = vsel %vm183_vm8, 1.0, %v1619_v1  ;;  %v305_v11 = vand.u32 4294901760, %v304_v5  ;;  %vm1908_vm10 = vmpackc.low %vm185_vm9, %vm183_vm8 }
  0x67   : > { %v310_v15 = vsub.f32 %v1312_v10, %v1312_v10  ;;  %1383 = vmatpush1.bf16.msra.mxu1 %v1382_v9  ;;  %v317_v17 = vand.u32 4294901760, %v316_v8  ;;  %1355 = vmatpush1.bf16.msk.msra.mxu0 %vm1908_vm10, %v1620_v32  ;;  %v324_v27 = vsub.f32 %v322_v7, %v323_v21  ;;  %v1360_v37 = vpack.c.bf16 %v316_v8, %v304_v5 }
  0x68   : > { %v306_v18 = vsub.f32 %v304_v5, %v305_v11  ;;  %1385 = vmatprep.subr.bf16.mxu1 %v1384_v6 }
  0x69   : > { %v311_v19 = vand.u32 4294901760, %v310_v15  ;;  %v318_v20 = vsub.f32 %v316_v8, %v317_v17  ;;  %v325_v36 = vand.u32 4294901760, %v324_v27  ;;  %v1362_v46 = vpack.c.bf16 %v322_v7, %v310_v15 }
  0x6a   : > { %883 = vmatmul.mubr.f32.vlgmr.msra.gmra.mrb[0].mxu1 %v1792_v22  ;;  %v307_v24 = vand.u32 4294901760, %v306_v18  ;;  %297 = vmatmul.mubr.f32.vlgmr.msra.gmra.mrb[0].mxu0 %v296_v16  ;;  %v1368_v33 = vpack.c.bf16 %v317_v17, %v305_v11 }
  0x6b   : > { %v312_v25 = vsub.f32 %v310_v15, %v311_v19  ;;  %v319_v26 = vand.u32 4294901760, %v318_v20  ;;  %1387 = vmatpush1.bf16.msra.mxu1 %v1386_v12  ;;  %387 = vmatprep.mubr.f32.mxu0 %v1619_v1  ;;  %v1370_v29 = vpack.c.bf16 %v323_v21, %v311_v19 }
  0x6c   : > { %961 = vmatprep.mubr.f32.mxu1 %v1619_v1  ;;  %1389 = vmatprep.subr.msk.bf16.mxu1 %vm1803_vm13, %v1620_v32 }
  0x6d   : > { %v313_v31 = vand.u32 4294901760, %v312_v25  ;;  %v1356_v34 = vpack.c.bf16 %v319_v26, %v307_v24 }
  0x6f   : > { %1357 = vmatprep.subr.bf16.mxu0 %v1356_v34  ;;  %v1358_v43 = vpack.c.bf16 %v325_v36, %v313_v31 }
  0x71   : > { %1359 = vmatpush1.bf16.msra.mxu0 %v1358_v43 }
  0x72   : > { %964 = vmatmul.mubr.f32.vlgmr.msra.gmra.mrb[0].mxu1 %v1810_v30  ;;  %1361 = vmatprep.subr.bf16.mxu0 %v1360_v37 }
  0x73   : > { %1391 = vmatpush1.bf16.msk.msra.mxu1 %vm1824_vm15, %v1620_v32  ;;  %1038 = vmatprep.mubr.f32.mxu1 %v1619_v1 }
  0x74   : > { %1393 = vmatprep.subr.bf16.mxu1 %v1392_v44  ;;  %389 = vmatmul.mubr.f32.vlgmr.msra.gmra.mrb[0].mxu0 %v1830_v41 }
  0x75   : > { %1363 = vmatpush1.bf16.msra.mxu0 %v1362_v46  ;;  %467 = vmatprep.mubr.f32.mxu0 %v1619_v1 }
  0x76   : > { %1365 = vmatprep.subr.msk.bf16.mxu0 %vm1887_vm7, %v1620_v32 }
  0x7a   : > { %1042 = vmatmul.mubr.f32.vlgmr.msra.gmra.mrb[0].mxu1 %v788_v40 }
  0x7b   : > { %1395 = vmatpush1.bf16.msra.mxu1 %v1394_v23  ;;  %1124 = vmatprep.mubr.f32.mxu1 %v1619_v1 }
  0x7c   : > { %1397 = vmatprep.subr.msk.bf16.mxu1 %vm1803_vm13, %v1620_v32  ;;  %470 = vmatmul.mubr.f32.vlgmr.msra.gmra.mrb[0].mxu0 %v1848_v49 }
  0x7d   : > { %1367 = vmatpush1.bf16.msk.msra.mxu0 %vm1908_vm10, %v1620_v32  ;;  %544 = vmatprep.mubr.f32.mxu0 %v1619_v1 }
  0x7e   : > { %1369 = vmatprep.subr.bf16.mxu0 %v1368_v33 }
  0x82   : > { %1126 = vmatmul.mubr.f32.vlgmr.msra.gmra.mrb[0].mxu1 %v1792_v22 }
  0x83   : > { %1399 = vmatpush1.bf16.msk.msra.mxu1 %vm1824_vm15, %v1620_v32  ;;  %1200 = vmatprep.mubr.f32.mxu1 %v1619_v1 }
  0x84   : > { %548 = vmatmul.mubr.f32.vlgmr.msra.gmra.mrb[0].mxu0 %v294_v57 }
  0x85   : > { %1371 = vmatpush1.bf16.msra.mxu0 %v1370_v29  ;;  %630 = vmatprep.mubr.f32.mxu0 %v1619_v1 }
  0x86   : > { %1373 = vmatprep.subr.msk.bf16.mxu0 %vm1887_vm7, %v1620_v32 }
  0x8a   : > { %1202 = vmatmul.mubr.f32.vlgmr.msra.gmra.mrb[0].mxu1 %v1792_v22 }
  0x8c   : > { %632 = vmatmul.mubr.f32.vlgmr.msra.gmra.mrb[0].mxu0 %v1830_v41 }
  0x8d   : > { %1375 = vmatpush1.bf16.msk.msra.mxu0 %vm1908_vm10, %v1620_v32  ;;  %706 = vmatprep.mubr.f32.mxu0 %v1619_v1 }
  0x94   : > { %708 = vmatmul.mubr.f32.vlgmr.msra.gmra.mrb[0].mxu0 %v1830_v41 }
 0x15d   : > { %v1203_v28 = vpop.f32.mrb[0].mxu1 }
 0x15e   : > { %1344 = vst [vmem:[%s151_s7 + $0x10] sm:$0xff] %v1203_v28  ;;  %v1205_v30 = vpop.f32.mrb[1].mxu1 }
 0x15f   : > { %1345 = vst [vmem:[%s151_s7 + $0x18] sm:$0xff] %v1205_v30 }
 0x167   : > { %v709_v1 = vpop.f32.mrb[0].mxu0 }
 0x168   : > { %1208 = vst [vmem:[%s151_s7] sm:$0xff] %v709_v1  ;;  %v711_v22 = vpop.f32.mrb[1].mxu0 }
 0x169   : > { %1209 = vst [vmem:[%s151_s7 + $0x8] sm:$0xff] %v711_v22 }
 0x16a   : > { %1556 = shalt.err (!%p1553_p8)
}
 0x16b   : > { %s1557_s30 = scalar_lea.hbm %s1975_s22, 512  ;;  %s1561_s4 = scalar_lea.hbm %s2020_s2, 1024 }
 0x16c   : > { %p1558_p11 = scmp.ne.s32.totalorder %s1975_s22, %s1557_s30  ;;  %p1562_p0 = scmp.lt.u32.totalorder %s1975_s22, %s2020_s2 }
 0x16d   : > { %p1563_p6 = scmp.lt.u32.totalorder %s1561_s4, %s1557_s30  ;;  %p1565_p12 = scmp.lt.u32.totalorder %s1557_s30, %s1975_s22 }
 0x16e   : > { %p1559_p13 = pnand %p1558_p11, %p2049_p10 }
 0x16f   : > { %p1564_p9 = por %p1563_p6, %p1562_p0 }
 0x170   : > { %p1560_p5 = pneg %p1559_p13 }
 0x171   : > { %p1566_p1 = por %p1565_p12, %p1564_p9 }
 0x173   : > { %p1567_p2 = pnand %p1566_p1, %p1560_p5 }
 0x175   : > { %1570 = shalt.err (!%p1567_p2)
}
 0x176   : > { %s1622_s26 = smov 256   ;;  %s1623_s5 = smov 512  }
 0x177   : > { %s1624_s6 = smov 16  }
 0x178   : > { %1428 = dma.vmem_to_hbm [thread:$0]  (%p2049_p10), %s1970_s8, 512, %s1975_s22, %s1977_s25, %s1622_s26, %s1623_s5, %s1624_s6  }
 0x179 PF: > { %p1445_p3 = scmp.ge.s32.totalorder %s1613_s12, 2  ;;  %s1242_s7 = sand.u32 1, %s1601_s9  }
 0x17a   : > { %p2050_p4 = scmp.ne.s32.totalorder %s2025_s20, 0  ;;  %s1243_s14 = scalar_lea.sflag [#allocation4], %s1242_s7 }
 0x17c   : > { %p1438_p7 = pnand %p1445_p3, %p2050_p4 }
 0x17e   : > { %1596 = dma.done.wait (!%p1438_p7), %s1243_s14, 512  }
 0x17f   : > { %1598 = vsyncadd (!%p1438_p7), %s1243_s14, 4294966784  ;;  %p14_p8 = scmp.ge.s32.totalorder %s1665_s15, 4   ;;  %s2051_s9 = smov %s1605_s10 }
 0x180   : > { %s2052_s10 = smov %s1609_s11  ;;  %s2053_s11 = smov %s1676_s18 }
 0x181   : > { %s2054_s12 = smov %s1665_s15  ;;  %16 = sbr.rel (!%p14_p8) target bundleno = 5 (0x5), region = 72 }
 0x188   :  { %1248 = vsyncpa [#allocation3], 1 }
 0x189   :  { %1250 = vsyncpa [#allocation3 + $0x1], 1 }
 0x18a   :  { %1251 = vsyncpa [#allocation6], 1 }
 0x18b   :  { %1252 = vsyncpa [#allocation4], 1 }
 0x18c   :  { %1254 = vsyncpa [#allocation4 + $0x1], 1 }

</bundles_post_ra>
